<compile_context>
chip_gen: v6e
topology: v6e:2x2x1
jax: 0.10.0
libtpu: 0.0.40
codegen_flags: <defaults>
</compile_context>

<pallas_src>
import functools

import jax
import jax.numpy as jnp
from jax.experimental import pallas as pl
from jax.experimental.pallas import tpu as pltpu

K_ORDERS = 3  # layer_func_derivs supports exactly 3 derivative orders


def _activation_deriv_kernel(x_ref, g_ref, f_ref, df_ref, *, d, n):
    """One batch tile: x (TB, N), g (TB, K*D*N) -> f (TB, N), df (TB, K*D*N)."""
    dn = d * n

    # sigma and its first three derivatives (tanh), computed in f32.
    x = x_ref[...].astype(jnp.float32)                     # (TB, N)
    s0 = jnp.tanh(x)
    s1 = 1.0 - s0 * s0
    s2 = -2.0 * s0 * s1
    s3 = -2.0 * (s1 * s1 + s0 * s2)

    f_ref[...] = s0.astype(f_ref.dtype)

    odt = df_ref.dtype
    # Static unrolled loop over the D derivative directions: reuse the single
    # (TB, N) s1/s2/s3 vregs (no D-wide lane-concatenated broadcasts), read the
    # matching (TB, N) slice of each order of g, and store each result directly
    # into its lane-aligned df slice (no full-tile concatenate temporary).
    for j in range(d):
        lo = j * n
        g0 = g_ref[:, lo:lo + n].astype(jnp.float32)
        g1 = g_ref[:, dn + lo:dn + lo + n].astype(jnp.float32)
        g2 = g_ref[:, 2 * dn + lo:2 * dn + lo + n].astype(jnp.float32)

        t = g0 * s2                                        # g0 * sigma''
        d0 = g0 * s1
        d1 = t * g0 + g1 * s1
        d2 = 3.0 * (t * g1) + (g0 * g0 * g0) * s3 + g2 * s1

        df_ref[:, lo:lo + n] = d0.astype(odt)
        df_ref[:, dn + lo:dn + lo + n] = d1.astype(odt)
        df_ref[:, 2 * dn + lo:2 * dn + lo + n] = d2.astype(odt)


def _choose_block_rows(batch, g_row_bytes, g_itemsize):
    """Pick a batch-tile size.

    Targets ~3 MiB of g per grid step, rounds to a dtype-aware sublane
    multiple, prefers a tile that divides the batch evenly, and keeps >= 4
    grid steps when the batch allows (v7x megacore + pipelining).
    """
    sublane = {4: 8, 2: 16, 1: 32}.get(g_itemsize, 8)
    target = 3 << 20  # ~3 MiB of g per step; 4x this (dbl-buffered in+out) < 16 MiB
    tb = max(1, target // max(g_row_bytes, 1))
    if batch >= 4 * sublane:
        tb = min(tb, batch // 4)   # >= 4 grid steps: both v7x TCs + double buffer
    tb = min(tb, batch)
    if tb >= batch:
        return batch, sublane
    tb = max(sublane, (tb // sublane) * sublane)
    # Prefer an evenly-dividing tile so no step becomes a masked partial store.
    t = tb
    while t >= sublane and batch % t != 0:
        t -= sublane
    if t >= sublane and batch % t == 0:
        return t, sublane
    return batch, sublane  # fallback: single full-array block (always legal)


def activation_function(x, g, *, block_rows=None):
    """Equivalent of ActivationFunction.forward((x, g)) with tanh activation."""
    B, N = x.shape
    Bg, K, D, Ng = g.shape
    assert B == Bg and N == Ng and K == K_ORDERS
    # NOTE: N is ideally a multiple of 128 so every K/D slice boundary stays
    # lane-aligned; other N is correct but slower.

    kdn = K * D * N
    g2d = g.reshape(B, kdn)          # free reshape: K, D, N are trailing axes

    g_item = jnp.dtype(g.dtype).itemsize
    x_item = jnp.dtype(x.dtype).itemsize
    if block_rows is None:
        tb, sublane = _choose_block_rows(B, kdn * g_item, g_item)
    else:
        sublane = {4: 8, 2: 16, 1: 32}.get(g_item, 8)
        tb = min(block_rows, B)
    assert tb == B or tb % sublane == 0, (
        f"batch tile must be a multiple of {sublane} (or the full batch)")

    grid = (pl.cdiv(B, tb),)
    kernel = functools.partial(_activation_deriv_kernel, d=D, n=N)

    # Explicit scoped-VMEM budget: double-buffered (g + df) + (x + f) tiles,
    # plus headroom.  Keeps the kernel portable across v5e/v6e/v7x defaults.
    tile_bytes = tb * kdn * g_item * 2 + tb * N * x_item * 2
    vmem_limit = int(min(max(2 * tile_bytes + (4 << 20), 16 << 20), 48 << 20))

    # Advisory cost: this op is pure HBM streaming; let XLA overlap neighbors.
    bytes_accessed = (B * N * x_item) * 2 + (B * kdn * g_item) * 2
    cost = pl.CostEstimate(
        flops=int(B * D * N * 13 + B * N * 8),
        transcendentals=int(B * N),
        bytes_accessed=int(bytes_accessed),
    )

    f, df2d = pl.pallas_call(
        kernel,
        out_shape=(
            jax.ShapeDtypeStruct((B, N), x.dtype),
            jax.ShapeDtypeStruct((B, kdn), g.dtype),
        ),
        grid=grid,
        in_specs=[
            pl.BlockSpec((tb, N), lambda i: (i, 0)),
            pl.BlockSpec((tb, kdn), lambda i: (i, 0)),
        ],
        out_specs=(
            pl.BlockSpec((tb, N), lambda i: (i, 0)),
            pl.BlockSpec((tb, kdn), lambda i: (i, 0)),
        ),
        compiler_params=pltpu.CompilerParams(
            dimension_semantics=("parallel",),
            vmem_limit_bytes=vmem_limit,
        ),
        cost_estimate=cost,
    )(x, g2d)

    return f, df2d.reshape(B, K, D, N)


def _reference(x, g):
    s0 = jnp.tanh(x)
    s1 = 1.0 - s0 ** 2
    s2 = -2.0 * s0 * s1
    s3 = -2.0 * (s1 ** 2 + s0 * s2)
    g0, g1, g2 = g[:, 0], g[:, 1], g[:, 2]
    d0 = g0 * s1[:, None, :]
    d1 = g0 ** 2 * s2[:, None, :] + g1 * s1[:, None, :]
    d2 = (3.0 * g0 * g1 * s2[:, None, :]
          + g0 ** 3 * s3[:, None, :]
          + g2 * s1[:, None, :])
    return s0, jnp.stack([d0, d1, d2], axis=1)


if __name__ == "__main__":
    B, K, D, N = 32, K_ORDERS, 4, 128
    key = jax.random.PRNGKey(0)
    kx, kg = jax.random.split(key)
    x = jax.random.normal(kx, (B, N), dtype=jnp.float32)
    g = jax.random.normal(kg, (B, K, D, N), dtype=jnp.float32)

    # Auto tiling picks tb=8 here -> grid=(4,): exercises the multi-step,
    # double-buffered pipelined path (and both TCs on v7x) even at demo size.
    f, df = activation_function(x, g)
    jax.block_until_ready((f, df))

    f_ref, df_ref = _reference(x, g)
    assert f.shape == (B, N) and df.shape == (B, K, D, N)
    assert jnp.allclose(f, f_ref, atol=1e-5, rtol=1e-5)
    assert jnp.allclose(df, df_ref, atol=1e-5, rtol=1e-5)

    print("KERNEL_OK")
</pallas_src>

<mosaic_0001>
module attributes {stable_mosaic.version = 11 : i64} {
  func.func @_activation_deriv_kernel(%arg0: i32, %arg1: memref<8x128xf32, #tpu.memory_space<vmem>>, %arg2: memref<8x1536xf32, #tpu.memory_space<vmem>>, %arg3: memref<8x128xf32, #tpu.memory_space<vmem>>, %arg4: memref<8x1536xf32, #tpu.memory_space<vmem>>) attributes {dimension_semantics = [#tpu.dimension_semantics<parallel>], iteration_bounds = array<i64: 4>, scalar_prefetch = 0 : i64, scratch_operands = 0 : i64, tpu.core_type = #tpu.core_type<tc>, window_params = [{transform_indices = @transform_0, window_bounds = array<i64: 8, 128>}, {transform_indices = @transform_1, window_bounds = array<i64: 8, 1536>}, {transform_indices = @transform_2, window_bounds = array<i64: 8, 128>}, {transform_indices = @transform_3, window_bounds = array<i64: 8, 1536>}]} {
    %c0 = arith.constant 0 : index
    %c0_0 = arith.constant 0 : index
    %0 = vector.load %arg1[%c0, %c0_0] : memref<8x128xf32, #tpu.memory_space<vmem>>, vector<8x128xf32>
    %1 = math.tanh %0 : vector<8x128xf32>
    %2 = arith.mulf %1, %1 : vector<8x128xf32>
    %cst = arith.constant 1.000000e+00 : f32
    %3 = vector.broadcast %cst : f32 to vector<8x128xf32>
    %4 = arith.subf %3, %2 : vector<8x128xf32>
    %cst_1 = arith.constant -2.000000e+00 : f32
    %5 = vector.broadcast %cst_1 : f32 to vector<8x128xf32>
    %6 = arith.mulf %5, %1 : vector<8x128xf32>
    %7 = arith.mulf %6, %4 : vector<8x128xf32>
    %8 = arith.mulf %4, %4 : vector<8x128xf32>
    %9 = arith.mulf %1, %7 : vector<8x128xf32>
    %10 = arith.addf %8, %9 : vector<8x128xf32>
    %cst_2 = arith.constant -2.000000e+00 : f32
    %11 = vector.broadcast %cst_2 : f32 to vector<8x128xf32>
    %12 = arith.mulf %11, %10 : vector<8x128xf32>
    %c0_3 = arith.constant 0 : index
    %c0_4 = arith.constant 0 : index
    %13 = vector.load %arg3[%c0_3, %c0_4] : memref<8x128xf32, #tpu.memory_space<vmem>>, vector<8x128xf32>
    tpu.vector_store %arg3[%c0_3, %c0_4], %1 {strides = array<i32>} : memref<8x128xf32, #tpu.memory_space<vmem>>, vector<8x128xf32>,
    %c0_5 = arith.constant 0 : index
    %c0_6 = arith.constant 0 : index
    %14 = vector.load %arg2[%c0_5, %c0_6] : memref<8x1536xf32, #tpu.memory_space<vmem>>, vector<8x128xf32>
    %c0_7 = arith.constant 0 : index
    %c512 = arith.constant 512 : index
    %15 = vector.load %arg2[%c0_7, %c512] : memref<8x1536xf32, #tpu.memory_space<vmem>>, vector<8x128xf32>
    %c0_8 = arith.constant 0 : index
    %c1024 = arith.constant 1024 : index
    %16 = vector.load %arg2[%c0_8, %c1024] : memref<8x1536xf32, #tpu.memory_space<vmem>>, vector<8x128xf32>
    %17 = arith.mulf %14, %7 : vector<8x128xf32>
    %18 = arith.mulf %14, %4 : vector<8x128xf32>
    %19 = arith.mulf %17, %14 : vector<8x128xf32>
    %20 = arith.mulf %15, %4 : vector<8x128xf32>
    %21 = arith.addf %19, %20 : vector<8x128xf32>
    %22 = arith.mulf %17, %15 : vector<8x128xf32>
    %cst_9 = arith.constant 3.000000e+00 : f32
    %23 = vector.broadcast %cst_9 : f32 to vector<8x128xf32>
    %24 = arith.mulf %23, %22 : vector<8x128xf32>
    %25 = arith.mulf %14, %14 : vector<8x128xf32>
    %26 = arith.mulf %25, %14 : vector<8x128xf32>
    %27 = arith.mulf %26, %12 : vector<8x128xf32>
    %28 = arith.addf %24, %27 : vector<8x128xf32>
    %29 = arith.mulf %16, %4 : vector<8x128xf32>
    %30 = arith.addf %28, %29 : vector<8x128xf32>
    %c0_10 = arith.constant 0 : index
    %c0_11 = arith.constant 0 : index
    %31 = vector.load %arg4[%c0_10, %c0_11] : memref<8x1536xf32, #tpu.memory_space<vmem>>, vector<8x128xf32>
    tpu.vector_store %arg4[%c0_10, %c0_11], %18 {strides = array<i32>} : memref<8x1536xf32, #tpu.memory_space<vmem>>, vector<8x128xf32>,
    %c0_12 = arith.constant 0 : index
    %c512_13 = arith.constant 512 : index
    %32 = vector.load %arg4[%c0_12, %c512_13] : memref<8x1536xf32, #tpu.memory_space<vmem>>, vector<8x128xf32>
    tpu.vector_store %arg4[%c0_12, %c512_13], %21 {strides = array<i32>} : memref<8x1536xf32, #tpu.memory_space<vmem>>, vector<8x128xf32>,
    %c0_14 = arith.constant 0 : index
    %c1024_15 = arith.constant 1024 : index
    %33 = vector.load %arg4[%c0_14, %c1024_15] : memref<8x1536xf32, #tpu.memory_space<vmem>>, vector<8x128xf32>
    tpu.vector_store %arg4[%c0_14, %c1024_15], %30 {strides = array<i32>} : memref<8x1536xf32, #tpu.memory_space<vmem>>, vector<8x128xf32>,
    %c0_16 = arith.constant 0 : index
    %c128 = arith.constant 128 : index
    %34 = vector.load %arg2[%c0_16, %c128] : memref<8x1536xf32, #tpu.memory_space<vmem>>, vector<8x128xf32>
    %c0_17 = arith.constant 0 : index
    %c640 = arith.constant 640 : index
    %35 = vector.load %arg2[%c0_17, %c640] : memref<8x1536xf32, #tpu.memory_space<vmem>>, vector<8x128xf32>
    %c0_18 = arith.constant 0 : index
    %c1152 = arith.constant 1152 : index
    %36 = vector.load %arg2[%c0_18, %c1152] : memref<8x1536xf32, #tpu.memory_space<vmem>>, vector<8x128xf32>
    %37 = arith.mulf %34, %7 : vector<8x128xf32>
    %38 = arith.mulf %34, %4 : vector<8x128xf32>
    %39 = arith.mulf %37, %34 : vector<8x128xf32>
    %40 = arith.mulf %35, %4 : vector<8x128xf32>
    %41 = arith.addf %39, %40 : vector<8x128xf32>
    %42 = arith.mulf %37, %35 : vector<8x128xf32>
    %cst_19 = arith.constant 3.000000e+00 : f32
    %43 = vector.broadcast %cst_19 : f32 to vector<8x128xf32>
    %44 = arith.mulf %43, %42 : vector<8x128xf32>
    %45 = arith.mulf %34, %34 : vector<8x128xf32>
    %46 = arith.mulf %45, %34 : vector<8x128xf32>
    %47 = arith.mulf %46, %12 : vector<8x128xf32>
    %48 = arith.addf %44, %47 : vector<8x128xf32>
    %49 = arith.mulf %36, %4 : vector<8x128xf32>
    %50 = arith.addf %48, %49 : vector<8x128xf32>
    %c0_20 = arith.constant 0 : index
    %c128_21 = arith.constant 128 : index
    %51 = vector.load %arg4[%c0_20, %c128_21] : memref<8x1536xf32, #tpu.memory_space<vmem>>, vector<8x128xf32>
    tpu.vector_store %arg4[%c0_20, %c128_21], %38 {strides = array<i32>} : memref<8x1536xf32, #tpu.memory_space<vmem>>, vector<8x128xf32>,
    %c0_22 = arith.constant 0 : index
    %c640_23 = arith.constant 640 : index
    %52 = vector.load %arg4[%c0_22, %c640_23] : memref<8x1536xf32, #tpu.memory_space<vmem>>, vector<8x128xf32>
    tpu.vector_store %arg4[%c0_22, %c640_23], %41 {strides = array<i32>} : memref<8x1536xf32, #tpu.memory_space<vmem>>, vector<8x128xf32>,
    %c0_24 = arith.constant 0 : index
    %c1152_25 = arith.constant 1152 : index
    %53 = vector.load %arg4[%c0_24, %c1152_25] : memref<8x1536xf32, #tpu.memory_space<vmem>>, vector<8x128xf32>
    tpu.vector_store %arg4[%c0_24, %c1152_25], %50 {strides = array<i32>} : memref<8x1536xf32, #tpu.memory_space<vmem>>, vector<8x128xf32>,
    %c0_26 = arith.constant 0 : index
    %c256 = arith.constant 256 : index
    %54 = vector.load %arg2[%c0_26, %c256] : memref<8x1536xf32, #tpu.memory_space<vmem>>, vector<8x128xf32>
    %c0_27 = arith.constant 0 : index
    %c768 = arith.constant 768 : index
    %55 = vector.load %arg2[%c0_27, %c768] : memref<8x1536xf32, #tpu.memory_space<vmem>>, vector<8x128xf32>
    %c0_28 = arith.constant 0 : index
    %c1280 = arith.constant 1280 : index
    %56 = vector.load %arg2[%c0_28, %c1280] : memref<8x1536xf32, #tpu.memory_space<vmem>>, vector<8x128xf32>
    %57 = arith.mulf %54, %7 : vector<8x128xf32>
    %58 = arith.mulf %54, %4 : vector<8x128xf32>
    %59 = arith.mulf %57, %54 : vector<8x128xf32>
    %60 = arith.mulf %55, %4 : vector<8x128xf32>
    %61 = arith.addf %59, %60 : vector<8x128xf32>
    %62 = arith.mulf %57, %55 : vector<8x128xf32>
    %cst_29 = arith.constant 3.000000e+00 : f32
    %63 = vector.broadcast %cst_29 : f32 to vector<8x128xf32>
    %64 = arith.mulf %63, %62 : vector<8x128xf32>
    %65 = arith.mulf %54, %54 : vector<8x128xf32>
    %66 = arith.mulf %65, %54 : vector<8x128xf32>
    %67 = arith.mulf %66, %12 : vector<8x128xf32>
    %68 = arith.addf %64, %67 : vector<8x128xf32>
    %69 = arith.mulf %56, %4 : vector<8x128xf32>
    %70 = arith.addf %68, %69 : vector<8x128xf32>
    %c0_30 = arith.constant 0 : index
    %c256_31 = arith.constant 256 : index
    %71 = vector.load %arg4[%c0_30, %c256_31] : memref<8x1536xf32, #tpu.memory_space<vmem>>, vector<8x128xf32>
    tpu.vector_store %arg4[%c0_30, %c256_31], %58 {strides = array<i32>} : memref<8x1536xf32, #tpu.memory_space<vmem>>, vector<8x128xf32>,
    %c0_32 = arith.constant 0 : index
    %c768_33 = arith.constant 768 : index
    %72 = vector.load %arg4[%c0_32, %c768_33] : memref<8x1536xf32, #tpu.memory_space<vmem>>, vector<8x128xf32>
    tpu.vector_store %arg4[%c0_32, %c768_33], %61 {strides = array<i32>} : memref<8x1536xf32, #tpu.memory_space<vmem>>, vector<8x128xf32>,
    %c0_34 = arith.constant 0 : index
    %c1280_35 = arith.constant 1280 : index
    %73 = vector.load %arg4[%c0_34, %c1280_35] : memref<8x1536xf32, #tpu.memory_space<vmem>>, vector<8x128xf32>
    tpu.vector_store %arg4[%c0_34, %c1280_35], %70 {strides = array<i32>} : memref<8x1536xf32, #tpu.memory_space<vmem>>, vector<8x128xf32>,
    %c0_36 = arith.constant 0 : index
    %c384 = arith.constant 384 : index
    %74 = vector.load %arg2[%c0_36, %c384] : memref<8x1536xf32, #tpu.memory_space<vmem>>, vector<8x128xf32>
    %c0_37 = arith.constant 0 : index
    %c896 = arith.constant 896 : index
    %75 = vector.load %arg2[%c0_37, %c896] : memref<8x1536xf32, #tpu.memory_space<vmem>>, vector<8x128xf32>
    %c0_38 = arith.constant 0 : index
    %c1408 = arith.constant 1408 : index
    %76 = vector.load %arg2[%c0_38, %c1408] : memref<8x1536xf32, #tpu.memory_space<vmem>>, vector<8x128xf32>
    %77 = arith.mulf %74, %7 : vector<8x128xf32>
    %78 = arith.mulf %74, %4 : vector<8x128xf32>
    %79 = arith.mulf %77, %74 : vector<8x128xf32>
    %80 = arith.mulf %75, %4 : vector<8x128xf32>
    %81 = arith.addf %79, %80 : vector<8x128xf32>
    %82 = arith.mulf %77, %75 : vector<8x128xf32>
    %cst_39 = arith.constant 3.000000e+00 : f32
    %83 = vector.broadcast %cst_39 : f32 to vector<8x128xf32>
    %84 = arith.mulf %83, %82 : vector<8x128xf32>
    %85 = arith.mulf %74, %74 : vector<8x128xf32>
    %86 = arith.mulf %85, %74 : vector<8x128xf32>
    %87 = arith.mulf %86, %12 : vector<8x128xf32>
    %88 = arith.addf %84, %87 : vector<8x128xf32>
    %89 = arith.mulf %76, %4 : vector<8x128xf32>
    %90 = arith.addf %88, %89 : vector<8x128xf32>
    %c0_40 = arith.constant 0 : index
    %c384_41 = arith.constant 384 : index
    %91 = vector.load %arg4[%c0_40, %c384_41] : memref<8x1536xf32, #tpu.memory_space<vmem>>, vector<8x128xf32>
    tpu.vector_store %arg4[%c0_40, %c384_41], %78 {strides = array<i32>} : memref<8x1536xf32, #tpu.memory_space<vmem>>, vector<8x128xf32>,
    %c0_42 = arith.constant 0 : index
    %c896_43 = arith.constant 896 : index
    %92 = vector.load %arg4[%c0_42, %c896_43] : memref<8x1536xf32, #tpu.memory_space<vmem>>, vector<8x128xf32>
    tpu.vector_store %arg4[%c0_42, %c896_43], %81 {strides = array<i32>} : memref<8x1536xf32, #tpu.memory_space<vmem>>, vector<8x128xf32>,
    %c0_44 = arith.constant 0 : index
    %c1408_45 = arith.constant 1408 : index
    %93 = vector.load %arg4[%c0_44, %c1408_45] : memref<8x1536xf32, #tpu.memory_space<vmem>>, vector<8x128xf32>
    tpu.vector_store %arg4[%c0_44, %c1408_45], %90 {strides = array<i32>} : memref<8x1536xf32, #tpu.memory_space<vmem>>, vector<8x128xf32>,
    return
  }
  func.func @transform_0(%arg0: i32) -> (i32, i32) {
    %c0_i32 = arith.constant 0 : i32
    %c0_i32_0 = arith.constant 0 : i32
    return %arg0, %c0_i32 : i32, i32
  }
  func.func @transform_1(%arg0: i32) -> (i32, i32) {
    %c0_i32 = arith.constant 0 : i32
    %c0_i32_0 = arith.constant 0 : i32
    return %arg0, %c0_i32 : i32, i32
  }
  func.func @transform_2(%arg0: i32) -> (i32, i32) {
    %c0_i32 = arith.constant 0 : i32
    %c0_i32_0 = arith.constant 0 : i32
    return %arg0, %c0_i32 : i32, i32
  }
  func.func @transform_3(%arg0: i32) -> (i32, i32) {
    %c0_i32 = arith.constant 0 : i32
    %c0_i32_0 = arith.constant 0 : i32
    return %arg0, %c0_i32 : i32, i32
  }
}

</mosaic_0001>

<bundles_post_ra>
// kernel: tpu_custom_call.1
= control target key start
LH: loop header
LB: loop body
LE: loop exit
PB: predicated region body
PF: predicated region fallthrough
CT: control target
= control target key end

     0   :  { %9 = vsyncpa [#allocation3], 0  ;;  %s1034_s0 = inlined_call_operand.hbm [shape: f32[32,128], index: 0, kind: input, shape index: {}]   ;;  %s1035_s1 = inlined_call_operand.hbm [shape: f32[32,1536], index: 1, kind: input, shape index: {}]   ;;  %s1036_s2 = inlined_call_operand.hbm [shape: f32[32,128], index: 2, kind: output, shape index: {0}]   ;;  %s1037_s3 = inlined_call_operand.hbm [shape: f32[32,1536], index: 3, kind: output, shape index: {1}]  }
   0x1   :  { %11 = vsyncpa [#allocation3 + $0x1], 0 }
   0x2   :  { %12 = vsyncpa [#allocation6], 0 }
   0x3   :  { %14 = vsyncpa [#allocation6 + $0x1], 0 }
   0x4   :  { %15 = vsyncpa [#allocation4], 0 }
   0x5   :  { %17 = vsyncpa [#allocation4 + $0x1], 0 }
   0x6   :  { %18 = vsyncpa [#allocation9], 0 }
   0x7   :  { %20 = vsyncpa [#allocation9 + $0x1], 0  ;;  %s736_s12 = smov 0   ;;  %s738_s13 = smov 0  }
   0x8   :  { %s740_s14 = smov 0   ;;  %s742_s15 = smov 0  }
   0x9 LB: > { %s757_s16 = sadd.s32 4294967295, %s710_s15   ;;  %s480_s17 = sadd.s32 4294967294, %s710_s15   ;;  %s710_s15 = sphi %s742_s15, %s1055_s15   ;;  %s706_s14 = sphi %s740_s14, %s1054_s14   ;;  %s702_s13 = sphi %s738_s13, %s1053_s13   ;;  %s698_s12 = sphi %s736_s12, %s1052_s12  }
   0xa   : > { %s761_s18 = sadd.s32 1, %s710_s15   ;;  %s33_s19 = sadd.s32 1, %s706_s14 }
   0xb   : > { %s30_s20 = ssub.s32 %s710_s15, %s761_s18  ;;  %p40_p0 = scmp.ne.s32.totalorder %s706_s14, %s702_s13 }
   0xc   : > { %p31_p1 = scmp.eq.s32.totalorder %s30_s20, 0  ;;  %p41_p2 = scmp.eq.s32.totalorder %s710_s15, 0 }
   0xd   : > { %p46_p3 = scmp.ne.s32.totalorder %s702_s13, %s698_s12  ;;  %p47_p4 = scmp.eq.s32.totalorder %s757_s16, 0 }
   0xe   : > { %s773_s21 = scalar_select %p31_p1, %s706_s14, %s33_s19  }
   0xf   : > { %p775_p5 = por %p41_p2, %p40_p0  ;;  %p779_p6 = por %p47_p4, %p46_p3 }
  0x10   : > { %p96_p7 = scmp.eq.s32.totalorder %s757_s16, 3  ;;  %p102_p8 = scmp.eq.s32.totalorder %s480_s17, 3 }
  0x11   : > { %s1041_s23 = scalar_select %p779_p6, 1, 0 }
  0x12   : > { %p520_p9 = scmp.lt.s32.totalorder %s710_s15, 4  ;;  %p785_p10 = por %p96_p7, %p40_p0 }
  0x13   : > { %p789_p11 = por %p102_p8, %p46_p3  ;;  %s794_s26 = sand.u32 1, %s706_s14  }
  0x14   : > { %s1042_s24 = scalar_select %p785_p10, 1, 0 }
  0x15   : > { %s1043_s25 = scalar_select %p789_p11, 1, 0 }
  0x16   : > { %s484_s27 = sshll.u32 %s710_s15, 7  ;;  %s483_s28 = sshll.u32 %s794_s26, 3 }
  0x17   : > { %s801_s4 = scalar_lea.hbm %s1034_s0, %s484_s27  ;;  %s152_s5 = scalar_lea.vmem [#allocation2], %s483_s28 }
  0x18   : > { %s159_s6 = sshll.u32 %s152_s5, 4  ;;  %p805_p12 = pnand %p520_p9, %p775_p5  ;;  %s809_s6 = int_to_ptr.vmem [resolvable:$true] %s159_s6 }
  0x19   : > { %s149_s8 = scalar_lea.sflag [#allocation3], %s794_s26  ;;  %s556_s9 = scalar_lea.hbm %s801_s4, 128 }
  0x1a   : > { %p557_p1 = scmp.ne.s32.totalorder %s801_s4, %s556_s9  ;;  %p558_p2 = pneg %p805_p12 }
  0x1b   : > { %s561_s17 = scalar_lea.hbm %s1034_s0, 512  ;;  %p562_p5 = scmp.lt.s32.totalorder %s801_s4, %s1034_s0 }
  0x1c   : > { %p559_p3 = pnand %p558_p2, %p557_p1  ;;  %p563_p7 = scmp.lt.s32.totalorder %s561_s17, %s556_s9 }
  0x1e   : > { %p560_p4 = pneg %p559_p3  ;;  %p564_p8 = por %p563_p7, %p562_p5 }
  0x20   : > { %p565_p9 = pnand %p564_p8, %p560_p4 }
  0x22   : > { %568 = shalt.err (!%p565_p9)
}
  0x23   : > { %s569_s22 = scalar_lea.vmem %s809_s6, 128  ;;  %s712_s27 = smov [#allocation2]  }
  0x24   : > { %p570_p13 = scmp.ne.s32.totalorder %s809_s6, %s569_s22  ;;  %s574_s28 = sshll.u32 %s712_s27, 4  ;;  %s575_s28 = int_to_ptr.vmem [resolvable:$false] %s574_s28 }
  0x25   : > { %s576_s29 = scalar_lea.vmem %s575_s28, 256  ;;  %p577_p0 = scmp.lt.s32.totalorder %s809_s6, %s575_s28 }
  0x26   : > { %p572_p1 = pnand %p570_p13, %p558_p2  ;;  %p578_p11 = scmp.lt.s32.totalorder %s576_s29, %s569_s22 }
  0x28   : > { %p573_p3 = pneg %p572_p1  ;;  %p579_p10 = por %p578_p11, %p577_p0 }
  0x2a   : > { %p580_p5 = pnand %p579_p10, %p573_p3 }
  0x2c   : > { %583 = shalt.err (!%p580_p5)
}
  0x2d   : > { %509 = dma.hbm_to_vmem [thread:$0]  (!%p805_p12), %s801_s4, 128, %s809_s6, %s149_s8  }
  0x2e   : > { %p1045_p13 = scmp.lt.s32.totalorder %s710_s15, 5  ;;  %p1046_p4 = scmp.ge.s32.totalorder %s710_s15, 1 }
  0x2f   : > { %s494_s5 = smul.u32 96, %s794_s26  ;;  %s167_s4 = scalar_lea.sflag [#allocation6], %s794_s26 }
  0x30   : > { %p842_p7 = pnand %p1046_p4, %p1045_p13  ;;  %s495_s9 = smul.u32 1536, %s710_s15 }
  0x31   : > { %s170_s19 = scalar_lea.vmem [#allocation5], %s494_s5  ;;  %s589_s27 = scalar_lea.hbm %s1035_s1, 6144 }
  0x32   : > { %s1047_s30 = scalar_select %p842_p7, 1, 0 }
  0x33   : > { %s851_s17 = scalar_lea.hbm %s1035_s1, %s495_s9  ;;  %s178_s20 = sshll.u32 %s170_s19, 4  ;;  %s179_s20 = int_to_ptr.vmem [resolvable:$true] %s178_s20 }
  0x34   : > { %s584_s6 = scalar_lea.hbm %s851_s17, 1536  ;;  %p590_p8 = scmp.lt.s32.totalorder %s851_s17, %s1035_s1 }
  0x35   : > { %p585_p10 = scmp.ne.s32.totalorder %s851_s17, %s584_s6  ;;  %p591_p9 = scmp.lt.s32.totalorder %s589_s27, %s584_s6 }
  0x37   : > { %p587_p11 = pnand %p585_p10, %p558_p2  ;;  %p592_p1 = por %p591_p9, %p590_p8 }
  0x39   : > { %p588_p0 = pneg %p587_p11 }
  0x3b   : > { %p593_p3 = pnand %p592_p1, %p588_p0 }
  0x3d   : > { %596 = shalt.err (!%p593_p3)
}
  0x3e   : > { %s597_s5 = scalar_lea.vmem %s179_s20, 1536  ;;  %s713_s26 = smov [#allocation5]  }
  0x3f   : > { %p598_p5 = scmp.ne.s32.totalorder %s179_s20, %s597_s5  ;;  %s602_s9 = sshll.u32 %s713_s26, 4  ;;  %s603_s9 = int_to_ptr.vmem [resolvable:$false] %s602_s9 }
  0x40   : > { %s604_s10 = scalar_lea.vmem %s603_s9, 3072  ;;  %p605_p10 = scmp.lt.s32.totalorder %s179_s20, %s603_s9 }
  0x41   : > { %p600_p13 = pnand %p598_p5, %p558_p2  ;;  %p606_p11 = scmp.lt.s32.totalorder %s604_s10, %s597_s5 }
  0x43   : > { %p601_p4 = pneg %p600_p13  ;;  %p607_p6 = por %p606_p11, %p605_p10 }
  0x45   : > { %p608_p7 = pnand %p607_p6, %p601_p4 }
  0x47   : > { %611 = shalt.err (!%p608_p7)
}
  0x48   : > { %512 = dma.hbm_to_vmem [thread:$0]  (!%p805_p12), %s851_s17, 1536, %s179_s20, %s167_s4  }
  0x49   : > { %p1048_p0 = scmp.ne.s32.totalorder %s1047_s30, 0 }
  0x4a   : > { %s875_s11 = sand.u32 (!%p1048_p0), 1, %s702_s13   ;;  %p1049_p2 = scmp.ne.s32.totalorder (!%p1048_p0), %s1041_s23, 0 }
  0x4b   : > { %187 = sbr.rel (%p1048_p0) target bundleno = 144 (0x90), region = 28  ;;  %s487_s19 = sshll.u32 (!%p1048_p0), %s875_s11, 3 }
  0x4c   : > { %s190_s6 = scalar_lea.sflag (!%p1048_p0), [#allocation3], %s875_s11  ;;  %s193_s8 = scalar_lea.vmem (!%p1048_p0), [#allocation2], %s487_s19 }
  0x50   : > { %681 = dma.done.wait (%p1049_p2), %s190_s6, 128  }
  0x51   : > { %683 = vsyncadd (%p1049_p2), %s190_s6, 4294967168  ;;  %s496_s7 = smul.u32 96, %s875_s11  ;;  %s199_s30 = scalar_lea.sflag [#allocation6], %s875_s11 }
  0x53   : > { %s887_s17 = scalar_lea.vmem [#allocation5], %s496_s7 }
  0x54   : > { %685 = dma.done.wait (%p1049_p2), %s199_s30, 1536  }
  0x55   : > { %687 = vsyncadd (%p1049_p2), %s199_s30, 4294965760  ;;  %v235_v0 = vld [vmem:[%s193_s8] sm:$0xff]  ;;  %s227_s20 = scalar_lea.vmem [#allocation7], %s487_s19  ;;  %v894_v1 = vld [vmem:[%s887_s17] sm:$0xff]  ;;  %s490_s22 = sshll.u32 %s757_s16, 7 }
  0x56   : > { %554 = vtanh.f32 %v235_v0  ;;  %s341_s4 = sshll.u32 %s227_s20, 4  ;;  %v898_v2 = vld [vmem:[%s887_s17 + $0x8] sm:$0xff]  ;;  %v901_v3 = vld [vmem:[%s887_s17 + $0x10] sm:$0xff]  ;;  %v904_v4 = vld [vmem:[%s887_s17 + $0x18] sm:$0xff]  ;;  %s911_s28 = scalar_lea.hbm %s1036_s2, %s490_s22  ;;  %v256_v6 = vmul.f32 %v894_v1, %v894_v1  ;;  %s906_s4 = int_to_ptr.vmem [resolvable:$true] %s341_s4 }
  0x57   : > { %v275_v7 = vmul.f32 %v898_v2, %v898_v2  ;;  %v294_v8 = vmul.f32 %v901_v3, %v901_v3  ;;  %v313_v9 = vmul.f32 %v904_v4, %v904_v4  ;;  %s323_s29 = scalar_lea.sflag [#allocation4], %s875_s11  ;;  %s612_s5 = scalar_lea.vmem %s906_s4, 128 }
  0x58   : > { %p613_p6 = scmp.ne.s32.totalorder %s906_s4, %s612_s5  ;;  %p1050_p12 = scmp.ne.s32.totalorder %s1042_s24, 0 }
  0x59   : > { %s714_s26 = smov [#allocation7]  }
  0x5a   : > { %p614_p7 = pnand %p613_p6, %p1050_p12  ;;  %s616_s9 = sshll.u32 %s714_s26, 4  ;;  %s617_s9 = int_to_ptr.vmem [resolvable:$false] %s616_s9 }
  0x5b   : > { %s618_s10 = scalar_lea.vmem %s617_s9, 256  ;;  %p619_p9 = scmp.lt.s32.totalorder %s906_s4, %s617_s9 }
  0x5c   : > { %p615_p8 = pneg %p614_p7  ;;  %p620_p1 = scmp.lt.s32.totalorder %s618_s10, %s612_s5 }
  0x5e   : > { %p621_p3 = por %p620_p1, %p619_p9 }
  0x60   : > { %p622_p5 = pnand %p621_p3, %p615_p8 }
  0x63   : > { %v555_v5 = vpop.eup %554 }
  0x64   : > { %245 = vst [vmem:[%s227_s20] sm:$0xff] %v555_v5  ;;  %v237_v10 = vmul.f32 %v555_v5, %v555_v5  ;;  %v239_v11 = vmul.f32 -2.0, %v555_v5 }
  0x65   : > { %625 = shalt.err (!%p622_p5)
}
  0x66   : > { %s626_s19 = scalar_lea.hbm %s911_s28, 128  ;;  %s630_s30 = scalar_lea.hbm %s1036_s2, 512 }
  0x67   : > { %p627_p13 = scmp.ne.s32.totalorder %s911_s28, %s626_s19  ;;  %p631_p11 = scmp.lt.s32.totalorder %s911_s28, %s1036_s2 }
  0x68   : > { %p632_p0 = scmp.lt.s32.totalorder %s630_s30, %s626_s19 }
  0x69   : > { %p628_p4 = pnand %p627_p13, %p1050_p12 }
  0x6a   : > { %p633_p2 = por %p632_p0, %p631_p11 }
  0x6b   : > { %p629_p10 = pneg %p628_p4 }
  0x6d   : > { %p634_p6 = pnand %p633_p2, %p629_p10 }
  0x6f   : > { %637 = shalt.err (!%p634_p6)
}
  0x70   : > { %502 = dma.vmem_to_hbm [thread:$0]  (%p1050_p12), %s906_s4, 128, %s911_s28, %s323_s29   ;;  %v942_v12 = vsub.f32 1.0, %v237_v10  ;;  %v248_v13 = vld [vmem:[%s887_s17 + $0x40] sm:$0xff]  ;;  %v267_v14 = vld [vmem:[%s887_s17 + $0x48] sm:$0xff]  ;;  %v257_v16 = vmul.f32 %v256_v6, %v894_v1  ;;  %v276_v17 = vmul.f32 %v275_v7, %v898_v2  ;;  %v295_v18 = vmul.f32 %v294_v8, %v901_v3  ;;  %v286_v25 = vld [vmem:[%s887_s17 + $0x50] sm:$0xff] }
  0x71   : > { %v247_v15 = vld [vmem:[%s887_s17 + $0x20] sm:$0xff]  ;;  %v314_v19 = vmul.f32 %v313_v9, %v904_v4  ;;  %v266_v24 = vld [vmem:[%s887_s17 + $0x28] sm:$0xff]  ;;  %s966_s4 = scalar_lea.vmem [#allocation8], %s496_s7  ;;  %v285_v34 = vld [vmem:[%s887_s17 + $0x30] sm:$0xff]  ;;  %s497_s7 = smul.u32 1536, %s757_s16 }
  0x72   : > { %v250_v20 = vmul.f32 %v894_v1, %v942_v12  ;;  %v240_v21 = vmul.f32 %v239_v11, %v942_v12  ;;  %v252_v22 = vmul.f32 %v247_v15, %v942_v12  ;;  %v241_v23 = vmul.f32 %v942_v12, %v942_v12  ;;  %v304_v51 = vld [vmem:[%s887_s17 + $0x38] sm:$0xff]  ;;  %s328_s29 = scalar_lea.sflag [#allocation9], %s875_s11  ;;  %s715_s16 = smov [#allocation8]  }
  0x73   : > { %v260_v26 = vmul.f32 %v248_v13, %v942_v12  ;;  %v269_v27 = vmul.f32 %v898_v2, %v942_v12  ;;  %v271_v28 = vmul.f32 %v266_v24, %v942_v12  ;;  %v279_v29 = vmul.f32 %v267_v14, %v942_v12  ;;  %v305_v60 = vld [vmem:[%s887_s17 + $0x58] sm:$0xff]  ;;  %s355_s17 = sshll.u32 %s966_s4, 4  ;;  %s353_s28 = scalar_lea.hbm %s1037_s3, %s497_s7  ;;  %s356_s17 = int_to_ptr.vmem [resolvable:$true] %s355_s17 }
  0x74   : > { %262 = vst [vmem:[%s966_s4] sm:$0xff] %v250_v20  ;;  %v249_v30 = vmul.f32 %v894_v1, %v240_v21  ;;  %v242_v31 = vmul.f32 %v555_v5, %v240_v21  ;;  %v268_v32 = vmul.f32 %v898_v2, %v240_v21  ;;  %v288_v33 = vmul.f32 %v901_v3, %v942_v12  ;;  %s638_s5 = scalar_lea.vmem %s356_s17, 1536  ;;  %s642_s26 = sshll.u32 %s715_s16, 4  ;;  %s643_s26 = int_to_ptr.vmem [resolvable:$false] %s642_s26 }
  0x75   : > { %281 = vst [vmem:[%s966_s4 + $0x8] sm:$0xff] %v269_v27  ;;  %v287_v35 = vmul.f32 %v901_v3, %v240_v21  ;;  %v290_v36 = vmul.f32 %v285_v34, %v942_v12  ;;  %v298_v37 = vmul.f32 %v286_v25, %v942_v12  ;;  %v307_v38 = vmul.f32 %v904_v4, %v942_v12  ;;  %p639_p7 = scmp.ne.s32.totalorder %s356_s17, %s638_s5  ;;  %s644_s9 = scalar_lea.vmem %s643_s26, 3072 }
  0x76   : > { %v251_v39 = vmul.f32 %v249_v30, %v894_v1  ;;  %v254_v40 = vmul.f32 %v249_v30, %v247_v15  ;;  %v243_v41 = vadd.f32 %v242_v31, %v241_v23  ;;  %v270_v42 = vmul.f32 %v268_v32, %v898_v2  ;;  %300 = vst [vmem:[%s966_s4 + $0x10] sm:$0xff] %v288_v33  ;;  %p645_p1 = scmp.lt.s32.totalorder %s356_s17, %s643_s26  ;;  %p646_p3 = scmp.lt.s32.totalorder %s644_s9, %s638_s5 }
  0x77   : > { %v273_v43 = vmul.f32 %v268_v32, %v266_v24  ;;  %v289_v44 = vmul.f32 %v287_v35, %v901_v3  ;;  %v292_v45 = vmul.f32 %v287_v35, %v285_v34  ;;  %319 = vst [vmem:[%s966_s4 + $0x18] sm:$0xff] %v307_v38  ;;  %v306_v46 = vmul.f32 %v904_v4, %v240_v21  ;;  %p640_p8 = pnand %p639_p7, %p1050_p12 }
  0x78   : > { %v253_v47 = vadd.f32 %v252_v22, %v251_v39  ;;  %v244_v48 = vmul.f32 -2.0, %v243_v41  ;;  %v255_v49 = vmul.f32 3.0, %v254_v40  ;;  %v272_v50 = vadd.f32 %v271_v28, %v270_v42  ;;  %p647_p5 = por %p646_p3, %p645_p1 }
  0x79   : > { %v274_v52 = vmul.f32 3.0, %v273_v43  ;;  %v291_v53 = vadd.f32 %v290_v36, %v289_v44  ;;  %v293_v54 = vmul.f32 3.0, %v292_v45  ;;  %v308_v55 = vmul.f32 %v306_v46, %v904_v4  ;;  %p641_p9 = pneg %p640_p8 }
  0x7a   : > { %263 = vst [vmem:[%s966_s4 + $0x20] sm:$0xff] %v253_v47  ;;  %v258_v56 = vmul.f32 %v257_v16, %v244_v48  ;;  %282 = vst [vmem:[%s966_s4 + $0x28] sm:$0xff] %v272_v50  ;;  %v277_v57 = vmul.f32 %v276_v17, %v244_v48  ;;  %v296_v58 = vmul.f32 %v295_v18, %v244_v48 }
  0x7b   : > { %v309_v59 = vmul.f32 %v304_v51, %v942_v12  ;;  %301 = vst [vmem:[%s966_s4 + $0x30] sm:$0xff] %v291_v53  ;;  %v311_v61 = vmul.f32 %v306_v46, %v304_v51  ;;  %v315_v62 = vmul.f32 %v314_v19, %v244_v48  ;;  %v317_v4 = vmul.f32 %v305_v60, %v942_v12  ;;  %p648_p13 = pnand %p647_p5, %p641_p9 }
  0x7c   : > { %v259_v63 = vadd.f32 %v258_v56, %v255_v49  ;;  %v278_v0 = vadd.f32 %v277_v57, %v274_v52  ;;  %v297_v1 = vadd.f32 %v296_v58, %v293_v54 }
  0x7d   : > { %v310_v2 = vadd.f32 %v309_v59, %v308_v55  ;;  %v312_v3 = vmul.f32 3.0, %v311_v61 }
  0x7e   : > { %v261_v5 = vadd.f32 %v260_v26, %v259_v63  ;;  %v280_v6 = vadd.f32 %v279_v29, %v278_v0  ;;  %v299_v7 = vadd.f32 %v298_v37, %v297_v1 }
  0x7f   : > { %320 = vst [vmem:[%s966_s4 + $0x38] sm:$0xff] %v310_v2  ;;  %v316_v8 = vadd.f32 %v315_v62, %v312_v3 }
  0x80   : > { %264 = vst [vmem:[%s966_s4 + $0x40] sm:$0xff] %v261_v5  ;;  %283 = vst [vmem:[%s966_s4 + $0x48] sm:$0xff] %v280_v6 }
  0x81   : > { %302 = vst [vmem:[%s966_s4 + $0x50] sm:$0xff] %v299_v7  ;;  %v318_v9 = vadd.f32 %v317_v4, %v316_v8 }
  0x83   : > { %321 = vst [vmem:[%s966_s4 + $0x58] sm:$0xff] %v318_v9 }
  0x84   : > { %651 = shalt.err (!%p648_p13)
}
  0x85   : > { %s652_s10 = scalar_lea.hbm %s353_s28, 1536  ;;  %s656_s6 = scalar_lea.hbm %s1037_s3, 6144 }
  0x86   : > { %p653_p4 = scmp.ne.s32.totalorder %s353_s28, %s652_s10  ;;  %p657_p0 = scmp.lt.s32.totalorder %s353_s28, %s1037_s3 }
  0x87   : > { %p658_p2 = scmp.lt.s32.totalorder %s656_s6, %s652_s10 }
  0x88   : > { %p654_p10 = pnand %p653_p4, %p1050_p12 }
  0x89   : > { %p659_p6 = por %p658_p2, %p657_p0 }
  0x8a   : > { %p655_p11 = pneg %p654_p10 }
  0x8c   : > { %p660_p7 = pnand %p659_p6, %p655_p11 }
  0x8e   : > { %663 = shalt.err (!%p660_p7)
}
  0x8f   : > { %503 = dma.vmem_to_hbm [thread:$0]  (%p1050_p12), %s356_s17, 1536, %s353_s28, %s328_s29  }
  0x90 PF: > { %p521_p8 = scmp.ge.s32.totalorder %s710_s15, 2  ;;  %s367_s20 = sand.u32 1, %s698_s12  }
  0x91   : > { %p1051_p9 = scmp.ne.s32.totalorder %s1043_s25, 0  ;;  %s368_s22 = scalar_lea.sflag [#allocation4], %s367_s20 }
  0x93   : > { %p514_p1 = pnand %p521_p8, %p1051_p9 }
  0x95   : > { %p515_p3 = pneg %p514_p1 }
  0x97   : > { %689 = dma.done.wait (%p515_p3), %s368_s22, 128  }
  0x98   : > { %691 = vsyncadd (%p515_p3), %s368_s22, 4294967168  ;;  %s377_s4 = scalar_lea.sflag [#allocation9], %s367_s20 }
  0x99   : > { %693 = dma.done.wait (%p515_p3), %s377_s4, 1536  }
  0x9a   : > { %695 = vsyncadd (%p515_p3), %s377_s4, 4294965760  ;;  %p23_p12 = scmp.ge.s32.totalorder %s761_s18, 6   ;;  %s1052_s12 = smov %s702_s13 }
  0x9b   : > { %s1053_s13 = smov %s706_s14  ;;  %s1054_s14 = smov %s773_s21 }
  0x9c   : > { %s1055_s15 = smov %s761_s18  ;;  %25 = sbr.rel (!%p23_p12) target bundleno = 9 (0x9), region = 103 }
  0xa1   :  { %382 = vsyncpa [#allocation3], 1 }
  0xa2   :  { %384 = vsyncpa [#allocation3 + $0x1], 1 }
  0xa3   :  { %385 = vsyncpa [#allocation6], 1 }
  0xa4   :  { %387 = vsyncpa [#allocation6 + $0x1], 1 }
  0xa5   :  { %388 = vsyncpa [#allocation4], 1 }
  0xa6   :  { %390 = vsyncpa [#allocation4 + $0x1], 1 }
  0xa7   :  { %391 = vsyncpa [#allocation9], 1 }
  0xa8   :  { %393 = vsyncpa [#allocation9 + $0x1], 1 }

</bundles_post_ra>
